<compile_context>
chip_gen: v7x
topology: tpu7x:2x2x1
jax: 0.10.0
libtpu: 0.0.40
codegen_flags: <defaults>
</compile_context>

<pallas_src>
import jax
import jax.numpy as jnp
import numpy as np
from jax.experimental import pallas as pl
from jax.experimental.pallas import tpu as pltpu


def _cast_kernel(x_ref, o_ref):
    # Pure elementwise dtype conversion on the VPU; whole tile at once.
    o_ref[...] = x_ref[...].astype(o_ref.dtype)


def _cdiv(a, b):
    return -(-a // b)


def _round_up(a, m):
    return _cdiv(a, m) * m


def _chip_budgets():
    """Return (single-buffer step bytes, small-tensor fallback bytes) per chip gen."""
    vmem = None
    try:
        vmem = int(pltpu.get_tpu_info().vmem_capacity_bytes)
    except Exception:
        vmem = None
    kind = ""
    try:
        kind = jax.devices()[0].device_kind.lower()
    except Exception:
        kind = ""
    # v7x: 64 MiB VMEM per TC (32 MiB scoped default), 3.2 TB/s HBM.
    if (vmem is not None and vmem <= (64 << 20)) or "v7" in kind:
        return 8 << 20, 12 << 20
    # v5e: 128 MiB VMEM but only 16 MiB default scoped; ~0.8 TB/s HBM.
    if "v5e" in kind or "v5 lite" in kind or "v5litepod" in kind or "v5" in kind:
        return 6 << 20, 2 << 20
    # v6e / default: 128 MiB VMEM (32 MiB scoped), ~1.4 TB/s HBM.
    return 12 << 20, 4 << 20


def _min_steps(total_bytes):
    """Minimum grid length so the software pipeline actually overlaps DMA."""
    if total_bytes >= (16 << 20):
        return 8
    if total_bytes >= (4 << 20):
        return 4
    return 1


def _choose_layout(n):
    """Largest W in {4096..128} (multiple of 128) dividing n, or None."""
    for w in (4096, 2048, 1024, 512, 256, 128):
        if n % w == 0:
            return n // w, w
    return None


def _cast_2d_pallas(x2d, dtype, step_bytes):
    """Cast an (R, W) lane-dense slab (W a multiple of 128) with a tiled kernel."""
    R, W = x2d.shape
    per_elem = x2d.dtype.itemsize + np.dtype(dtype).itemsize
    total_bytes = R * W * per_elem

    # Rows per step under the per-generation single-buffer budget; multiple of
    # 32 rows keeps both source and packed destination tiles sublane-aligned
    # for f32(8)/bf16(16)/int8-fp8(32).
    row_budget = max(32, (step_bytes // (W * per_elem)) // 32 * 32)

    target_steps = max(_min_steps(total_bytes), _cdiv(R, row_budget))
    if target_steps > 1 and target_steps % 2:
        target_steps += 1          # even step count balances v7x's 2 TensorCores

    tr0 = max(32, _round_up(_cdiv(R, target_steps), 32))
    if tr0 >= R:
        tr, grid_n = R, 1          # full-extent row block is always legal
    else:
        tr, grid_n = tr0, _cdiv(R, tr0)
        if grid_n % 2:
            # Best-effort nudge to an even grid length (v7x TC balance).
            for cand in (tr0 - 32, tr0 + 32, tr0 - 64, tr0 + 64):
                if 32 <= cand < R and _cdiv(R, cand) % 2 == 0:
                    tr, grid_n = cand, _cdiv(R, cand)
                    break

    blk_bytes = tr * W * per_elem
    vmem_limit = int(min(2 * blk_bytes + (4 << 20), 100 << 20))  # double-buffered in+out

    return pl.pallas_call(
        _cast_kernel,
        out_shape=jax.ShapeDtypeStruct((R, W), dtype),
        grid_spec=pltpu.PrefetchScalarGridSpec(
            num_scalar_prefetch=0,
            grid=(grid_n,),
            in_specs=[pl.BlockSpec((tr, W), lambda i: (i, 0))],
            out_specs=pl.BlockSpec((tr, W), lambda i: (i, 0)),
        ),
        compiler_params=pltpu.CompilerParams(
            dimension_semantics=("parallel",),
            vmem_limit_bytes=vmem_limit,
        ),
        cost_estimate=pl.CostEstimate(
            flops=0, transcendentals=0, bytes_accessed=total_bytes),
    )(x2d)


def _cast_1d_pallas(x1d, dtype, step_bytes):
    """Cast a flat array whose size has no multiple-of-128 divisor.

    Runs directly on the 1-D array with a cdiv grid and a masked final block —
    still exactly one HBM read + one HBM write (no slice/concat passes).
    """
    (n,) = x1d.shape
    per_elem = x1d.dtype.itemsize + np.dtype(dtype).itemsize
    total_bytes = n * per_elem

    blk_budget = max(1024, (step_bytes // per_elem) // 1024 * 1024)
    target_steps = max(_min_steps(total_bytes), _cdiv(n, blk_budget))
    if target_steps > 1 and target_steps % 2:
        target_steps += 1

    blk = max(1024, _round_up(_cdiv(n, target_steps), 1024))  # 8*128-aligned
    if blk >= n:
        blk, grid_n = n, 1         # full-extent block: legal for any n
    else:
        grid_n = _cdiv(n, blk)     # last block masked by Pallas

    vmem_limit = int(min(2 * blk * per_elem + (4 << 20), 100 << 20))

    return pl.pallas_call(
        _cast_kernel,
        out_shape=jax.ShapeDtypeStruct((n,), dtype),
        grid_spec=pltpu.PrefetchScalarGridSpec(
            num_scalar_prefetch=0,
            grid=(grid_n,),
            in_specs=[pl.BlockSpec((blk,), lambda i: (i,))],
            out_specs=pl.BlockSpec((blk,), lambda i: (i,)),
        ),
        compiler_params=pltpu.CompilerParams(
            dimension_semantics=("parallel",),
            vmem_limit_bytes=vmem_limit,
        ),
        cost_estimate=pl.CostEstimate(
            flops=0, transcendentals=0, bytes_accessed=total_bytes),
    )(x1d)


def to_dtype(x: jax.Array, dtype, *, small_fallback_bytes=None, _step_bytes=None) -> jax.Array:
    """Pallas equivalent of ToDtype(dtype)(x) == x.to(dtype).

    small_fallback_bytes: if total HBM traffic (read + write) is below this,
    use a plain XLA convert (identical result, lower fixed overhead). Defaults
    to a generation-aware threshold (scales with HBM bandwidth).
    _step_bytes: test-only override of the per-step single-buffer budget.
    """
    # TODO(synk): float->integer targets use XLA convert_element_type semantics
    # (clamping / RNE), which differ from torch .to()'s truncate-toward-zero;
    # float<->float casts match torch bit-exactly.
    out_dt = np.dtype(dtype)
    if x.dtype == out_dt:
        return x                     # torch .to() is a no-op for matching dtype

    n = x.size
    if n == 0:
        return x.astype(out_dt)

    step_bytes, auto_fallback = _chip_budgets()
    if _step_bytes is not None:
        step_bytes = int(_step_bytes)
    if small_fallback_bytes is None:
        small_fallback_bytes = auto_fallback

    total_bytes = n * (x.dtype.itemsize + out_dt.itemsize)
    if total_bytes < small_fallback_bytes:
        # Tiny tensor: pallas_call fixed overhead dominates; XLA convert wins.
        return x.astype(out_dt)

    x_flat = x.reshape(-1)           # contiguous reshape: no HBM copy

    layout = _choose_layout(n)
    if layout is not None:
        R, W = layout
        out2d = _cast_2d_pallas(x_flat.reshape(R, W), out_dt, step_bytes)
        return out2d.reshape(x.shape)

    # No lane-aligned 2-D factorization: flat 1-D kernel with masked last block.
    out1d = _cast_1d_pallas(x_flat, out_dt, step_bytes)
    return out1d.reshape(x.shape)


if __name__ == "__main__":
    key = jax.random.PRNGKey(0)

    # (B, C, H, W) = (2, 4, 16, 16) feature map, f32 -> bf16 (ToDtype(torch.bfloat16)).
    x = jax.random.normal(key, (2, 4, 16, 16), dtype=jnp.float32)
    # Disable the tiny-tensor XLA fallback so the Pallas kernel is exercised
    # even at this small demo shape.
    y = to_dtype(x, jnp.bfloat16, small_fallback_bytes=0)
    jax.block_until_ready(y)
    assert y.shape == x.shape and y.dtype == jnp.bfloat16
    assert jnp.array_equal(y, x.astype(jnp.bfloat16)), "mismatch vs reference cast"

    # Size with no multiple-of-128 divisor: exercises the flat 1-D kernel path.
    x2 = jax.random.normal(jax.random.PRNGKey(0), (5, 131), dtype=jnp.float32)
    y2 = to_dtype(x2, jnp.bfloat16, small_fallback_bytes=0)
    jax.block_until_ready(y2)
    assert y2.shape == x2.shape and y2.dtype == jnp.bfloat16
    assert jnp.array_equal(y2, x2.astype(jnp.bfloat16)), "mismatch on 1-D path"

    # Multi-step grid with a masked partial final row block (tiny step budget
    # forces several tiles): exercises the pipelined cdiv-grid path.
    x3 = jax.random.normal(jax.random.PRNGKey(0), (260, 256), dtype=jnp.float32)
    y3 = to_dtype(x3, jnp.bfloat16, small_fallback_bytes=0, _step_bytes=64 << 10)
    jax.block_until_ready(y3)
    assert y3.shape == x3.shape and y3.dtype == jnp.bfloat16
    assert jnp.array_equal(y3, x3.astype(jnp.bfloat16)), "mismatch on masked-block path"

    # >4 MiB traffic: min-steps / even-grid pipeline logic with default budgets.
    x4 = jax.random.normal(jax.random.PRNGKey(0), (1024, 1024), dtype=jnp.float32)
    y4 = to_dtype(x4, jnp.bfloat16, small_fallback_bytes=0)
    jax.block_until_ready(y4)
    assert y4.shape == x4.shape and y4.dtype == jnp.bfloat16
    assert jnp.array_equal(y4, x4.astype(jnp.bfloat16)), "mismatch on pipelined path"

    print("KERNEL_OK")
</pallas_src>

<mosaic_0001>
module attributes {stable_mosaic.version = 11 : i64} {
  func.func @_cast_kernel(%arg0: i32, %arg1: memref<1x2048xf32, #tpu.memory_space<vmem>>, %arg2: memref<1x2048xbf16, #tpu.memory_space<vmem>>) attributes {dimension_semantics = [#tpu.dimension_semantics<parallel>], iteration_bounds = array<i64: 1>, scalar_prefetch = 0 : i64, scratch_operands = 0 : i64, tpu.core_type = #tpu.core_type<tc>, window_params = [{transform_indices = @transform_0, window_bounds = array<i64: 1, 2048>}, {transform_indices = @transform_1, window_bounds = array<i64: 1, 2048>}]} {
    %c0 = arith.constant 0 : index
    %c0_0 = arith.constant 0 : index
    %0 = vector.load %arg1[%c0, %c0_0] : memref<1x2048xf32, #tpu.memory_space<vmem>>, vector<1x2048xf32>
    %1 = arith.truncf %0 : vector<1x2048xf32> to vector<1x2048xbf16>
    %c0_1 = arith.constant 0 : index
    %c0_2 = arith.constant 0 : index
    %2 = vector.load %arg2[%c0_1, %c0_2] : memref<1x2048xbf16, #tpu.memory_space<vmem>>, vector<1x2048xbf16>
    tpu.vector_store %arg2[%c0_1, %c0_2], %1 {strides = array<i32>} : memref<1x2048xbf16, #tpu.memory_space<vmem>>, vector<1x2048xbf16>,
    return
  }
  func.func @transform_0(%arg0: i32) -> (i32, i32) {
    %c0_i32 = arith.constant 0 : i32
    %c0_i32_0 = arith.constant 0 : i32
    return %arg0, %c0_i32 : i32, i32
  }
  func.func @transform_1(%arg0: i32) -> (i32, i32) {
    %c0_i32 = arith.constant 0 : i32
    %c0_i32_0 = arith.constant 0 : i32
    return %arg0, %c0_i32 : i32, i32
  }
}

</mosaic_0001>

<bundles_post_ra>
// kernel: tpu_custom_call.1
= control target key start
LH: loop header
LB: loop body
LE: loop exit
PB: predicated region body
PF: predicated region fallthrough
CT: control target
= control target key end

     0   :  { %6 = vsyncpa [#allocation3], 0  ;;  %s445_s0 = inlined_call_operand.hbm [shape: f32[1,2048], index: 0, kind: input, shape index: {}]   ;;  %s446_s1 = inlined_call_operand.hbm [shape: bf16[1,2048], index: 1, kind: output, shape index: {}]  }
   0x1   :  { %7 = vsyncpa [#allocation4], 0  ;;  %s348_s6 = smov [#allocation2]   ;;  %s300_s10 = scalar_lea.hbm %s445_s0, 256 }
   0x2   :  { %s14_s7 = sshll.u32 %s348_s6, 4  ;;  %p301_p0 = scmp.ne.s32.totalorder %s445_s0, %s300_s10  ;;  %s15_s7 = int_to_ptr.vmem [resolvable:$true] %s14_s7 }
   0x3   :  { %p304_p1 = scmp.lt.u32.totalorder %s300_s10, %s445_s0 }
   0x5   :  { %p306_p2 = pnand %p304_p1, %p301_p0 }
   0x7   :  { %309 = shalt.err (!%p306_p2)
}
   0x8   :  { %s310_s15 = scalar_lea.vmem %s15_s7, 256  ;;  %p315_p4 = scmp.lt.s32.totalorder %s15_s7, %s15_s7 }
   0x9   :  { %p311_p3 = scmp.ne.s32.totalorder %s15_s7, %s310_s15  ;;  %p316_p5 = scmp.lt.s32.totalorder %s310_s15, %s310_s15 }
   0xb   :  { %p317_p6 = por %p316_p5, %p315_p4 }
   0xd   :  { %p318_p7 = pnand %p317_p6, %p311_p3 }
   0xf   :  { %321 = shalt.err (!%p318_p7)
}
  0x10   :  { %17 = dma.hbm_to_vmem [thread:$0]  %s445_s0, 256, %s15_s7, [#allocation3]  }
  0x11   :  { %344 = dma.done.wait [#allocation3], 256  }
  0x12   :  { %345 = vsyncadd [#allocation3], 4294967040  ;;  %v25_v0 = vlaneseq  ;;  %vm237_vm0 = vcmask 1040384   ;;  %vm240_vm1 = vcmask 1041409   ;;  %v349_v1 = vmov 1966171168  }
  0x13   :  { %v142_v2 = vunpack.c.l.s4 %v349_v1  ;;  %vm238_vm2 = vsmask.f32 256  ;;  %vm241_vm3 = vsmask.f32 1280  ;;  %vm244_vm5 = vcmask 1042434   ;;  %v21_v16 = vld [vmem:[#allocation2] sm:$0xff] }
  0x14   :  { %v26_v3 = vshrl.u32 %v25_v0, 7  ;;  %vm373_vm4 = vmand %vm237_vm0, %vm238_vm2  ;;  %vm245_vm6 = vsmask.f32 2304  ;;  %vm248_vm8 = vcmask 1043459   ;;  %vm249_vm9 = vsmask.f32 3328 }
  0x15   :  { %v143_v5 = vunpack.c.0.s8 %v142_v2  ;;  %vm377_vm7 = vmand %vm240_vm1, %vm241_vm3  ;;  %vm252_vm10 = vcmask 1044484   ;;  %vm253_vm14 = vsmask.f32 4352  ;;  %vm256_vm15 = vcmask 1045509   ;;  %v22_v23 = vld [vmem:[#allocation2 + $0x8] sm:$0xff]  ;;  %v268_v60 = vld [vmem:[#allocation5] sm:$0xff] }
  0x16   :  { %v27_v7 = vsub.s32 0, %v26_v3  ;;  %v31_v8 = vsub.s32 1, %v26_v3  ;;  %v35_v9 = vsub.s32 2, %v26_v3  ;;  %v39_v10 = vsub.s32 3, %v26_v3  ;;  %vm243_vm11 = vmor %vm377_vm7, %vm373_vm4  ;;  %s350_s0 = smov [#allocation5]  }
  0x17   :  { %v43_v11 = vsub.s32 4, %v26_v3  ;;  %v47_v12 = vsub.s32 5, %v26_v3  ;;  %v51_v13 = vsub.s32 6, %v26_v3  ;;  %v55_v14 = vsub.s32 7, %v26_v3  ;;  %vm246_vm12 = vmand %vm244_vm5, %vm245_vm6  ;;  %s280_s18 = sshll.u32 %s350_s0, 4  ;;  %s281_s18 = int_to_ptr.vmem [resolvable:$true] %s280_s18 }
  0x18   :  { %vm387_vm13 = vmor %vm246_vm12, %vm243_vm11  ;;  %vm257_vm0 = vsmask.f32 5376  ;;  %vm260_vm1 = vcmask 1046534   ;;  %v146_v17 = vsub.s32 %v143_v5, %v26_v3  ;;  %vm261_vm3 = vsmask.f32 6400  ;;  %v271_v3 = vld [vmem:[#allocation5 + $0x8] sm:$0xff]  ;;  %p327_p9 = scmp.lt.s32.totalorder %s281_s18, %s281_s18 }
  0x19   :  { %vm393_vm2 = vmand %vm248_vm8, %vm249_vm9  ;;  %vm264_vm4 = vcmask 1047559   ;;  %vm265_vm7 = vsmask.f32 7424  ;;  %v28_v19 = vrot.slane %v21_v16, %v27_v7  ;;  %v32_v20 = vrot.slane %v21_v16, %v31_v8  ;;  %s322_s19 = scalar_lea.vmem %s281_s18, 256 }
  0x1a   :  { %v36_v21 = vrot.slane %v21_v16, %v35_v9  ;;  %v40_v22 = vrot.slane %v21_v16, %v39_v10  ;;  %vm251_vm5 = vmor %vm393_vm2, %vm387_vm13  ;;  %v44_v24 = vrot.slane %v21_v16, %v43_v11  ;;  %v48_v25 = vrot.slane %v21_v16, %v47_v12  ;;  %p323_p8 = scmp.ne.s32.totalorder %s281_s18, %s322_s19  ;;  %p328_p10 = scmp.lt.s32.totalorder %s322_s19, %s322_s19 }
  0x1b   :  { %v52_v26 = vrot.slane %v21_v16, %v51_v13  ;;  %v56_v27 = vrot.slane %v21_v16, %v55_v14  ;;  %vm254_vm6 = vmand %vm252_vm10, %vm253_vm14  ;;  %v289_v28 = vpack.c.bf16 %v32_v20, %v28_v19  ;;  %v60_v31 = vrot.slane %v22_v23, %v27_v7 }
  0x1c   :  { %v290_v29 = vpack.c.bf16 %v40_v22, %v36_v21  ;;  %vm403_vm8 = vmor %vm254_vm6, %vm251_vm5  ;;  %v64_v32 = vrot.slane %v22_v23, %v31_v8  ;;  %v291_v33 = vpack.c.bf16 %v48_v25, %v44_v24  ;;  %v68_v36 = vrot.slane %v22_v23, %v35_v9  ;;  %p329_p11 = por %p328_p10, %p327_p9 }
  0x1d   :  { %v292_v34 = vpack.c.bf16 %v56_v27, %v52_v26  ;;  %vm409_vm9 = vmand %vm256_vm15, %vm257_vm0  ;;  %v72_v37 = vrot.slane %v22_v23, %v39_v10  ;;  %v147_v38 = vrot.slane %v289_v28, %v146_v17  ;;  %v76_v40 = vrot.slane %v22_v23, %v43_v11 }
  0x1e   :  { %v154_v39 = vrot.slane %v290_v29, %v146_v17  ;;  %vm259_vm10 = vmor %vm409_vm9, %vm403_vm8  ;;  %v80_v41 = vrot.slane %v22_v23, %v47_v12  ;;  %v161_v42 = vrot.slane %v291_v33, %v146_v17  ;;  %v84_v44 = vrot.slane %v22_v23, %v51_v13  ;;  %p330_p12 = pnand %p329_p11, %p323_p8 }
  0x1f   :  { %v168_v43 = vrot.slane %v292_v34, %v146_v17  ;;  %vm262_vm11 = vmand %vm260_vm1, %vm261_vm3  ;;  %v88_v45 = vrot.slane %v22_v23, %v55_v14  ;;  %v293_v48 = vpack.c.bf16 %v64_v32, %v60_v31  ;;  %v294_v49 = vpack.c.bf16 %v72_v37, %v68_v36 }
  0x20   :  { %v169_v46 = vcombine.low %v147_v38, %v154_v39  ;;  %vm419_vm12 = vmor %vm262_vm11, %vm259_vm10  ;;  %v295_v50 = vpack.c.bf16 %v80_v41, %v76_v40 }
  0x21   :  { %v170_v51 = vcombine.low %v161_v42, %v168_v43  ;;  %vm425_vm13 = vmand %vm264_vm4, %vm265_vm7  ;;  %v296_v53 = vpack.c.bf16 %v88_v45, %v84_v44  ;;  %v196_v55 = vrot.slane %v293_v48, %v146_v17  ;;  %v203_v56 = vrot.slane %v294_v49, %v146_v17 }
  0x22   :  { %v177_v54 = vrot.slane %v169_v46, %v146_v17  ;;  %v210_v57 = vrot.slane %v295_v50, %v146_v17  ;;  %vm267_vm14 = vmor %vm425_vm13, %vm419_vm12 }
  0x23   :  { %v184_v58 = vrot.slane %v170_v51, %v146_v17  ;;  %v217_v59 = vrot.slane %v296_v53, %v146_v17  ;;  %v218_v61 = vcombine.low %v196_v55, %v203_v56 }
  0x25   :  { %v185_v62 = vcombine.low %v177_v54, %v184_v58  ;;  %v219_v63 = vcombine.low %v210_v57, %v217_v59  ;;  %v226_v0 = vrot.slane %v218_v61, %v146_v17 }
  0x27   :  { %v269_v1 = vsel %vm267_vm14, %v185_v62, %v268_v60  ;;  %v233_v2 = vrot.slane %v219_v63, %v146_v17 }
  0x28   :  { %270 = vst [vmem:[#allocation5] sm:$0xff] %v269_v1 }
  0x29   :  { %v234_v4 = vcombine.low %v226_v0, %v233_v2 }
  0x2b   :  { %v272_v5 = vsel %vm267_vm14, %v234_v4, %v271_v3 }
  0x2c   :  { %273 = vst [vmem:[#allocation5 + $0x8] sm:$0xff] %v272_v5 }
  0x2d   :  { %333 = shalt.err (!%p330_p12)
}
  0x2e   :  { %s334_s22 = scalar_lea.hbm %s446_s1, 256 }
  0x2f   :  { %p335_p13 = scmp.ne.s32.totalorder %s446_s1, %s334_s22  ;;  %p338_p0 = scmp.lt.u32.totalorder %s334_s22, %s446_s1 }
  0x31   :  { %p340_p1 = pnand %p338_p0, %p335_p13 }
  0x33   :  { %343 = shalt.err (!%p340_p1)
}
  0x34   :  { %283 = dma.vmem_to_hbm [thread:$0]  %s281_s18, 256, %s446_s1, [#allocation4]  }
  0x35   :  { %346 = dma.done.wait [#allocation4], 256  }
  0x36   :  { %347 = vsyncadd [#allocation4], 4294967040 }
  0x37   :  { %287 = vsyncpa [#allocation3], 1 }
  0x38   :  { %288 = vsyncpa [#allocation4], 1 }

</bundles_post_ra>
